<compile_context>
chip_gen: v6e
topology: v6e:2x2x1
jax: 0.10.0
libtpu: 0.0.40
codegen_flags: <defaults>
</compile_context>

<pallas_src>
import functools

import numpy as np
import jax
import jax.numpy as jnp
from jax import lax
from jax.experimental import pallas as pl
from jax.experimental.pallas import tpu as pltpu

_EPS = 1e-8        # matches STFTLoss(eps=1e-8)
_TN = 128          # frequency lane-tile (per cos/sin half)


def _round_up(x, m):
    return ((x + m - 1) // m) * m


def _device_tiling():
    """(frame-tile cap, vmem_limit_bytes) tuned per TPU generation."""
    try:
        kind = jax.devices()[0].device_kind.lower()
    except Exception:
        kind = ""
    if ("v5" in kind) or ("v6" in kind):       # 128 MiB physical VMEM
        return 512, 96 * 1024 * 1024
    return 256, 40 * 1024 * 1024               # v7x (64 MiB physical) and default


# ------------------------------ Pallas kernel --------------------------------
def _stft_loss_kernel(xy_ref, w_ref, out_ref, *, tm, tn, nb):
    i = pl.program_id(1)   # frame-tile axis within this core's range

    @pl.when(i == 0)
    def _():
        out_ref[...] = jnp.zeros_like(out_ref)

    # rows [0, tm) = x frames, rows [tm, 2*tm) = y frames (raw, window folded into w)
    xy = xy_ref[...]                           # (2*tm, n_fft) bf16

    d2_acc = jnp.zeros((tn,), jnp.float32)
    ysq_acc = jnp.zeros((tn,), jnp.float32)
    llog_acc = jnp.zeros((tn,), jnp.float32)
    llin_acc = jnp.zeros((tn,), jnp.float32)

    # Static loop over frequency blocks; w stays VMEM-resident, one MXU matmul per block
    for j in range(nb):
        wblk = w_ref[:, j * 2 * tn:(j + 1) * 2 * tn]          # (n_fft, 2*tn) [cos|sin]
        res = jnp.dot(xy, wblk, preferred_element_type=jnp.float32)   # (2*tm, 2*tn)
        xre, xim = res[:tm, :tn], res[:tm, tn:]
        yre, yim = res[tm:, :tn], res[tm:, tn:]

        x_mag = jnp.sqrt(jnp.maximum(xre * xre + xim * xim, _EPS))
        y_mag = jnp.sqrt(jnp.maximum(yre * yre + yim * yim, _EPS))

        diff = y_mag - x_mag
        d2_acc = d2_acc + jnp.sum(diff * diff, axis=0)                 # ||y-x||^2
        ysq_acc = ysq_acc + jnp.sum(y_mag * y_mag, axis=0)             # ||y||^2
        llog_acc = llog_acc + jnp.sum(jnp.abs(jnp.log(x_mag) - jnp.log(y_mag)), axis=0)
        llin_acc = llin_acc + jnp.sum(jnp.abs(diff), axis=0)

    row = lax.broadcasted_iota(jnp.int32, (8, tn), 0)
    part = jnp.where(row == 0, d2_acc[None, :],
           jnp.where(row == 1, ysq_acc[None, :],
           jnp.where(row == 2, llog_acc[None, :],
           jnp.where(row == 3, llin_acc[None, :], 0.0))))
    out_ref[...] += part[None, :, :]


def _stft_loss_sums(xy, w, tm, vmem_limit, tn=_TN):
    """Returns (8,) vector; rows 0..3 hold d2, ysq, l1_log, l1_lin sums."""
    n_rows, n_fft = xy.shape
    n_tiles = n_rows // (2 * tm)
    assert n_tiles % 2 == 0
    nt_half = n_tiles // 2
    nb = w.shape[1] // (2 * tn)
    kernel = functools.partial(_stft_loss_kernel, tm=tm, tn=tn, nb=nb)
    out = pl.pallas_call(
        kernel,
        out_shape=jax.ShapeDtypeStruct((2, 8, tn), jnp.float32),
        grid_spec=pltpu.PrefetchScalarGridSpec(
            num_scalar_prefetch=0,
            grid=(2, nt_half),                 # (core-split, frame tiles per core)
            in_specs=[
                pl.BlockSpec((2 * tm, n_fft), lambda c, i: (c * nt_half + i, 0)),
                # whole [cos|sin] slab resident in VMEM, single-buffered
                pl.BlockSpec(memory_space=pltpu.MemorySpace.VMEM),
            ],
            out_specs=pl.BlockSpec((1, 8, tn), lambda c, i: (c, 0, 0)),
        ),
        compiler_params=pltpu.CompilerParams(
            dimension_semantics=("parallel", "arbitrary"),
            vmem_limit_bytes=vmem_limit),
    )(xy, w)
    # per-core slabs + cross-lane reduction done once, outside the kernel
    return jnp.sum(out, axis=(0, 2))


# ------------------------------ JAX glue --------------------------------------
def _windowed_dft_matrix(n_fft, win_length, tn=_TN):
    """Window-folded, lane-padded, per-block-interleaved [cos | sin] matrix for bins
    [0, n_fft/2); returns also the windowed Nyquist basis vector (handled outside)."""
    assert n_fft % 2 == 0
    nk = n_fft // 2                        # in-kernel bin count (Nyquist trimmed)
    fp = _round_up(nk, tn)
    nb = fp // tn
    # torch.hann_window(win_length) is periodic: 0.5*(1 - cos(2*pi*n/win_length)),
    # zero-padded (centered) to n_fft as torch.stft does.
    n = np.arange(win_length, dtype=np.float64)
    win = 0.5 - 0.5 * np.cos(2.0 * np.pi * n / win_length)
    lpad = (n_fft - win_length) // 2
    win = np.pad(win, (lpad, n_fft - win_length - lpad))

    t = np.arange(n_fft, dtype=np.float64)[:, None]
    f = np.arange(fp, dtype=np.float64)[None, :]
    ang = 2.0 * np.pi * t * f / n_fft
    cos_w = win[:, None] * np.cos(ang)
    sin_w = win[:, None] * np.sin(ang)
    cos_w[:, nk:] = 0.0                    # lane-padding columns are exactly zero
    sin_w[:, nk:] = 0.0
    # interleave per tn-block so weight block j = [cos_block_j | sin_block_j]
    w = np.stack([cos_w.reshape(n_fft, nb, tn),
                  sin_w.reshape(n_fft, nb, tn)], axis=2).reshape(n_fft, 2 * fp)
    # Nyquist bin k = n_fft/2: real part basis win*cos(pi*t); imaginary part is zero.
    nyq = (win * np.cos(np.pi * np.arange(n_fft, dtype=np.float64))).astype(np.float32)
    return w.astype(np.float32), nyq, nk, fp


def _frame_signal(x2d, n_fft, hop):
    """torch.stft-style framing (center=True, pad_mode='reflect'); NO window applied
    (window is folded into the DFT matrix). x2d: (B, T) -> (B*frames, n_fft)."""
    B, T = x2d.shape
    pad = n_fft // 2
    xp = jnp.pad(x2d, ((0, 0), (pad, pad)), mode='reflect')
    num_frames = 1 + (T + 2 * pad - n_fft) // hop
    starts = np.arange(num_frames) * hop
    idx = starts[:, None] + np.arange(n_fft)[None, :]      # (frames, n_fft)
    frames = xp[:, idx]                                    # (B, frames, n_fft)
    return frames.reshape(B * num_frames, n_fft)


def multi_resolution_stft_loss(x, y,
                               fft_sizes=(1024, 2048, 512),
                               hop_sizes=(120, 240, 50),
                               win_lengths=(600, 1200, 240),
                               w_sc=1.0, w_log_mag=1.0, w_lin_mag=0.0, w_phs=0.0):
    """Forward of MultiResolutionSTFTLoss (output='loss', reduction='mean', scale=None)."""
    # TODO(synk): phase loss (w_phs>0; data-dependent torch.nonzero/index_select gather)
    #             and mel/chroma filterbanks (scale != None, librosa) are not
    #             implemented; both are disabled by the module's defaults.
    tm_cap, vmem_limit = _device_tiling()
    x2 = x.reshape(-1, x.shape[-1]).astype(jnp.float32)
    y2 = y.reshape(-1, y.shape[-1]).astype(jnp.float32)
    total = jnp.float32(0.0)
    # exact value the kernel adds per padded element to ||y||^2 (sqrt then square in f32)
    pad_val = float(np.float32(np.sqrt(np.float32(_EPS))) ** 2)
    for n_fft, hop, wl in zip(fft_sizes, hop_sizes, win_lengths):
        w_np, nyq_np, nk, fp = _windowed_dft_matrix(n_fft, wl)
        w = jnp.asarray(w_np, dtype=jnp.bfloat16)
        nyq = jnp.asarray(nyq_np)

        xf = _frame_signal(x2, n_fft, hop)                 # (n_valid, n_fft) f32
        yf = _frame_signal(y2, n_fft, hop)
        n_valid = xf.shape[0]
        n_freq = n_fft // 2 + 1
        # TODO(synk): framing is still an XLA gather materialized in HBM (~n_fft/hop x
        #             expansion); an in-kernel manual-DMA framing path would remove it,
        #             but hop does not divide n_fft for the module's default configs.

        # --- Nyquist-bin epilogue (f32), keeps in-kernel lanes a multiple of 128 ------
        x_nyq = jnp.sqrt(jnp.maximum((xf @ nyq) ** 2, _EPS))
        y_nyq = jnp.sqrt(jnp.maximum((yf @ nyq) ** 2, _EPS))
        dnq = y_nyq - x_nyq
        d2_n = jnp.sum(dnq * dnq)
        ysq_n = jnp.sum(y_nyq * y_nyq)
        llog_n = jnp.sum(jnp.abs(jnp.log(x_nyq) - jnp.log(y_nyq)))
        llin_n = jnp.sum(jnp.abs(dnq))

        # --- frame tiling: interleave x/y per tile so the kernel does ONE matmul ------
        tm = min(tm_cap, _round_up(n_valid, 16))           # bf16-friendly sublane tile
        n_pad = _round_up(n_valid, 2 * tm)                 # even #tiles for the TC split
        if n_pad != n_valid:
            xf = jnp.pad(xf, ((0, n_pad - n_valid), (0, 0)))
            yf = jnp.pad(yf, ((0, n_pad - n_valid), (0, 0)))
        n_tiles = n_pad // tm
        xy = jnp.concatenate(
            [xf.reshape(n_tiles, 1, tm, n_fft), yf.reshape(n_tiles, 1, tm, n_fft)],
            axis=1).reshape(n_tiles * 2 * tm, n_fft).astype(jnp.bfloat16)

        sums = _stft_loss_sums(xy, w, tm, vmem_limit)
        d2, ysq, l1_log, l1_lin = sums[0], sums[1], sums[2], sums[3]
        # padded frame rows / padded frequency lanes contribute exactly pad_val each to
        # ||y||^2 (and exactly 0 to the other three statistics); subtract analytically.
        ysq = ysq - pad_val * (n_pad * fp - n_valid * nk)

        d2 = d2 + d2_n
        ysq = ysq + ysq_n
        l1_log = l1_log + llog_n
        l1_lin = l1_lin + llin_n

        n_elems = n_valid * n_freq
        sc_loss = jnp.sqrt(d2) / jnp.sqrt(ysq)             # spectral convergence
        log_loss = l1_log / n_elems                        # mean L1 on log magnitudes
        lin_loss = l1_lin / n_elems                        # mean L1 on linear magnitudes
        total = total + w_sc * sc_loss + w_log_mag * log_loss + w_lin_mag * lin_loss
    return total / len(fft_sizes)


# --------------------- pure-JAX reference (for sanity check) ------------------
def _reference_loss(x, y, fft_sizes, hop_sizes, win_lengths,
                    w_sc=1.0, w_log_mag=1.0, w_lin_mag=0.0):
    def hann_padded(wl, n_fft):
        n = np.arange(wl, dtype=np.float64)
        w = 0.5 - 0.5 * np.cos(2.0 * np.pi * n / wl)
        lpad = (n_fft - wl) // 2
        return jnp.asarray(np.pad(w, (lpad, n_fft - wl - lpad)).astype(np.float32))

    x2 = x.reshape(-1, x.shape[-1]).astype(jnp.float32)
    y2 = y.reshape(-1, y.shape[-1]).astype(jnp.float32)
    total = jnp.float32(0.0)
    for n_fft, hop, wl in zip(fft_sizes, hop_sizes, win_lengths):
        win = hann_padded(wl, n_fft)
        xf = _frame_signal(x2, n_fft, hop) * win[None, :]
        yf = _frame_signal(y2, n_fft, hop) * win[None, :]
        X = jnp.fft.rfft(xf, axis=-1)
        Y = jnp.fft.rfft(yf, axis=-1)
        x_mag = jnp.sqrt(jnp.maximum(jnp.real(X) ** 2 + jnp.imag(X) ** 2, _EPS))
        y_mag = jnp.sqrt(jnp.maximum(jnp.real(Y) ** 2 + jnp.imag(Y) ** 2, _EPS))
        sc = jnp.linalg.norm(y_mag - x_mag) / jnp.linalg.norm(y_mag)
        logm = jnp.mean(jnp.abs(jnp.log(x_mag) - jnp.log(y_mag)))
        linm = jnp.mean(jnp.abs(x_mag - y_mag))
        total = total + w_sc * sc + w_log_mag * logm + w_lin_mag * linm
    return total / len(fft_sizes)


if __name__ == "__main__":
    key = jax.random.PRNGKey(0)
    kx, ky = jax.random.split(key)
    B, C, T = 2, 2, 256
    x = jax.random.normal(kx, (B, C, T), dtype=jnp.float32)
    y = jax.random.normal(ky, (B, C, T), dtype=jnp.float32)

    # small multi-resolution configuration consistent with the module's structure
    fft_sizes = (64, 128, 32)
    hop_sizes = (16, 32, 8)
    win_lengths = (32, 64, 16)

    loss = multi_resolution_stft_loss(x, y, fft_sizes, hop_sizes, win_lengths)
    loss = jax.block_until_ready(loss)

    ref = jax.block_until_ready(_reference_loss(x, y, fft_sizes, hop_sizes, win_lengths))
    assert np.isfinite(float(loss))
    assert abs(float(loss) - float(ref)) <= 1e-3 + 1e-2 * abs(float(ref)), (float(loss), float(ref))
    print("KERNEL_OK")
</pallas_src>

<mosaic_0001>
module attributes {stable_mosaic.version = 11 : i64} {
  func.func @_stft_loss_kernel(%arg0: i32, %arg1: i32, %arg2: memref<160x64xbf16, #tpu.memory_space<vmem>>, %arg3: memref<64x256xbf16, #tpu.memory_space<vmem>>, %arg4: memref<1x8x128xf32, #tpu.memory_space<vmem>>) attributes {dimension_semantics = [#tpu.dimension_semantics<parallel>, #tpu.dimension_semantics<arbitrary>], iteration_bounds = array<i64: 2, 1>, scalar_prefetch = 0 : i64, scratch_operands = 0 : i64, tpu.core_type = #tpu.core_type<tc>, window_params = [{transform_indices = @transform_0, window_bounds = array<i64: 160, 64>}, {pipeline_mode = #tpu.pipeline_mode<synchronous>, transform_indices = @transform_1, window_bounds = array<i64: 64, 256>}, {transform_indices = @transform_2, window_bounds = array<i64: 1, 8, 128>}]} {
    %c0_i32 = arith.constant 0 : i32
    %0 = arith.cmpi eq, %arg1, %c0_i32 : i32
    %1 = arith.extui %0 : i1 to i32
    %c0_i32_0 = arith.constant 0 : i32
    %2 = arith.cmpi ne, %1, %c0_i32_0 : i32
    scf.if %2 {
      %cst_22 = arith.constant 0.000000e+00 : f32
      %72 = vector.broadcast %cst_22 : f32 to vector<1x8x128xf32>
      %c0_23 = arith.constant 0 : index
      %c0_24 = arith.constant 0 : index
      %c0_25 = arith.constant 0 : index
      %73 = vector.load %arg4[%c0_23, %c0_24, %c0_25] : memref<1x8x128xf32, #tpu.memory_space<vmem>>, vector<1x8x128xf32>
      tpu.vector_store %arg4[%c0_23, %c0_24, %c0_25], %72 {strides = array<i32>} : memref<1x8x128xf32, #tpu.memory_space<vmem>>, vector<1x8x128xf32>,
    } else {
    }
    %c0 = arith.constant 0 : index
    %c0_1 = arith.constant 0 : index
    %3 = vector.load %arg2[%c0, %c0_1] : memref<160x64xbf16, #tpu.memory_space<vmem>>, vector<160x64xbf16>
    %cst = arith.constant 0.000000e+00 : f32
    %4 = vector.broadcast %cst : f32 to vector<128xf32>
    %cst_2 = arith.constant 0.000000e+00 : f32
    %5 = vector.broadcast %cst_2 : f32 to vector<128xf32>
    %cst_3 = arith.constant 0.000000e+00 : f32
    %6 = vector.broadcast %cst_3 : f32 to vector<128xf32>
    %cst_4 = arith.constant 0.000000e+00 : f32
    %7 = vector.broadcast %cst_4 : f32 to vector<128xf32>
    %c0_5 = arith.constant 0 : index
    %c0_6 = arith.constant 0 : index
    %8 = vector.load %arg3[%c0_5, %c0_6] : memref<64x256xbf16, #tpu.memory_space<vmem>>, vector<64x256xbf16>
    %cst_7 = arith.constant dense<0.000000e+00> : vector<160x256xf32>
    %9 = tpu.matmul %3, %8, %cst_7 {dimension_numbers = #tpu.dot_dimension_numbers<[1], [0], [0], [1], [0, 0, 1, 1], [], []>} : vector<160x64xbf16>, vector<64x256xbf16>, vector<160x256xf32> -> vector<160x256xf32>
    %10 = vector.extract_strided_slice %9 {offsets = [0, 0], sizes = [80, 128], strides = [1, 1]} : vector<160x256xf32> to vector<80x128xf32>
    %11 = vector.extract_strided_slice %9 {offsets = [0, 128], sizes = [80, 128], strides = [1, 1]} : vector<160x256xf32> to vector<80x128xf32>
    %12 = vector.extract_strided_slice %9 {offsets = [80, 0], sizes = [80, 128], strides = [1, 1]} : vector<160x256xf32> to vector<80x128xf32>
    %13 = vector.extract_strided_slice %9 {offsets = [80, 128], sizes = [80, 128], strides = [1, 1]} : vector<160x256xf32> to vector<80x128xf32>
    %14 = arith.mulf %10, %10 : vector<80x128xf32>
    %15 = arith.mulf %11, %11 : vector<80x128xf32>
    %16 = arith.addf %14, %15 : vector<80x128xf32>
    %cst_8 = arith.constant 9.99999993E-9 : f32
    %17 = vector.broadcast %cst_8 : f32 to vector<80x128xf32>
    %18 = arith.maximumf %16, %17 : vector<80x128xf32>
    %19 = math.sqrt %18 : vector<80x128xf32>
    %20 = arith.mulf %12, %12 : vector<80x128xf32>
    %21 = arith.mulf %13, %13 : vector<80x128xf32>
    %22 = arith.addf %20, %21 : vector<80x128xf32>
    %cst_9 = arith.constant 9.99999993E-9 : f32
    %23 = vector.broadcast %cst_9 : f32 to vector<80x128xf32>
    %24 = arith.maximumf %22, %23 : vector<80x128xf32>
    %25 = math.sqrt %24 : vector<80x128xf32>
    %26 = arith.subf %25, %19 : vector<80x128xf32>
    %27 = arith.mulf %26, %26 : vector<80x128xf32>
    %cst_10 = arith.constant dense<0.000000e+00> : vector<128xf32>
    %28 = vector.multi_reduction <add>, %27, %cst_10 [0] : vector<80x128xf32> to vector<128xf32>
    %29 = arith.addf %4, %28 : vector<128xf32>
    %30 = arith.mulf %25, %25 : vector<80x128xf32>
    %cst_11 = arith.constant dense<0.000000e+00> : vector<128xf32>
    %31 = vector.multi_reduction <add>, %30, %cst_11 [0] : vector<80x128xf32> to vector<128xf32>
    %32 = arith.addf %5, %31 : vector<128xf32>
    %33 = math.log %19 : vector<80x128xf32>
    %34 = math.log %25 : vector<80x128xf32>
    %35 = arith.subf %33, %34 : vector<80x128xf32>
    %36 = math.absf %35 : vector<80x128xf32>
    %cst_12 = arith.constant dense<0.000000e+00> : vector<128xf32>
    %37 = vector.multi_reduction <add>, %36, %cst_12 [0] : vector<80x128xf32> to vector<128xf32>
    %38 = arith.addf %6, %37 : vector<128xf32>
    %39 = math.absf %26 : vector<80x128xf32>
    %cst_13 = arith.constant dense<0.000000e+00> : vector<128xf32>
    %40 = vector.multi_reduction <add>, %39, %cst_13 [0] : vector<80x128xf32> to vector<128xf32>
    %41 = arith.addf %7, %40 : vector<128xf32>
    %42 = tpu.iota {dimensions = array<i32: 0>} : vector<8x128xi32>
    %c0_i32_14 = arith.constant 0 : i32
    %43 = vector.broadcast %c0_i32_14 : i32 to vector<8x128xi32>
    %44 = arith.cmpi eq, %42, %43 : vector<8x128xi32>
    %45 = vector.shape_cast %29 : vector<128xf32> to vector<1x128xf32>
    %c1_i32 = arith.constant 1 : i32
    %46 = vector.broadcast %c1_i32 : i32 to vector<8x128xi32>
    %47 = arith.cmpi eq, %42, %46 : vector<8x128xi32>
    %48 = vector.shape_cast %32 : vector<128xf32> to vector<1x128xf32>
    %c2_i32 = arith.constant 2 : i32
    %49 = vector.broadcast %c2_i32 : i32 to vector<8x128xi32>
    %50 = arith.cmpi eq, %42, %49 : vector<8x128xi32>
    %51 = vector.shape_cast %38 : vector<128xf32> to vector<1x128xf32>
    %c3_i32 = arith.constant 3 : i32
    %52 = vector.broadcast %c3_i32 : i32 to vector<8x128xi32>
    %53 = arith.cmpi eq, %42, %52 : vector<8x128xi32>
    %54 = vector.shape_cast %41 : vector<128xf32> to vector<1x128xf32>
    %cst_15 = arith.constant 0.000000e+00 : f32
    %55 = vector.shape_cast %54 : vector<1x128xf32> to vector<1x128xf32>
    %56 = vector.broadcast %55 : vector<1x128xf32> to vector<8x128xf32>
    %57 = vector.broadcast %cst_15 : f32 to vector<8x128xf32>
    %58 = arith.select %53, %56, %57 : vector<8x128xi1>, vector<8x128xf32>
    %59 = vector.shape_cast %51 : vector<1x128xf32> to vector<1x128xf32>
    %60 = vector.broadcast %59 : vector<1x128xf32> to vector<8x128xf32>
    %61 = arith.select %50, %60, %58 : vector<8x128xi1>, vector<8x128xf32>
    %62 = vector.shape_cast %48 : vector<1x128xf32> to vector<1x128xf32>
    %63 = vector.broadcast %62 : vector<1x128xf32> to vector<8x128xf32>
    %64 = arith.select %47, %63, %61 : vector<8x128xi1>, vector<8x128xf32>
    %65 = vector.shape_cast %45 : vector<1x128xf32> to vector<1x128xf32>
    %66 = vector.broadcast %65 : vector<1x128xf32> to vector<8x128xf32>
    %67 = arith.select %44, %66, %64 : vector<8x128xi1>, vector<8x128xf32>
    %c0_16 = arith.constant 0 : index
    %c0_17 = arith.constant 0 : index
    %c0_18 = arith.constant 0 : index
    %68 = vector.load %arg4[%c0_16, %c0_17, %c0_18] : memref<1x8x128xf32, #tpu.memory_space<vmem>>, vector<1x8x128xf32>
    %69 = vector.shape_cast %67 : vector<8x128xf32> to vector<1x8x128xf32>
    %70 = arith.addf %68, %69 : vector<1x8x128xf32>
    %c0_19 = arith.constant 0 : index
    %c0_20 = arith.constant 0 : index
    %c0_21 = arith.constant 0 : index
    %71 = vector.load %arg4[%c0_19, %c0_20, %c0_21] : memref<1x8x128xf32, #tpu.memory_space<vmem>>, vector<1x8x128xf32>
    tpu.vector_store %arg4[%c0_19, %c0_20, %c0_21], %70 {strides = array<i32>} : memref<1x8x128xf32, #tpu.memory_space<vmem>>, vector<1x8x128xf32>,
    return
  }
  func.func @transform_0(%arg0: i32, %arg1: i32) -> (i32, i32) {
    %c1_i32 = arith.constant 1 : i32
    %0 = arith.muli %arg0, %c1_i32 : i32
    %1 = arith.addi %0, %arg1 : i32
    %c0_i32 = arith.constant 0 : i32
    %c0_i32_0 = arith.constant 0 : i32
    return %1, %c0_i32 : i32, i32
  }
  func.func @transform_1(%arg0: i32, %arg1: i32) -> (i32, i32) {
    %c0_i32 = arith.constant 0 : i32
    %c0_i32_0 = arith.constant 0 : i32
    %c0_i32_1 = arith.constant 0 : i32
    return %c0_i32, %c0_i32_0 : i32, i32
  }
  func.func @transform_2(%arg0: i32, %arg1: i32) -> (i32, i32, i32) {
    %c0_i32 = arith.constant 0 : i32
    %c0_i32_0 = arith.constant 0 : i32
    %c0_i32_1 = arith.constant 0 : i32
    return %arg0, %c0_i32, %c0_i32_0 : i32, i32, i32
  }
}

</mosaic_0001>

<bundles_post_ra>
// kernel: tpu_custom_call.1
= control target key start
LH: loop header
LB: loop body
LE: loop exit
PB: predicated region body
PF: predicated region fallthrough
CT: control target
= control target key end

     0   :  { %7 = vsyncpa [#allocation3], 0  ;;  %s1663_s0 = inlined_call_operand.vmem [shape: bf16[320,64], index: 0, kind: input, shape index: {}]   ;;  %s1664_s1 = inlined_call_operand.vmem [shape: bf16[64,256], index: 1, kind: input, shape index: {}]   ;;  %s1665_s2 = inlined_call_operand.hbm [shape: f32[2,8,128], index: 2, kind: output, shape index: {}]  }
   0x1   :  { %9 = vsyncpa [#allocation3 + $0x1], 0  ;;  %s1230_s9 = smov 0   ;;  %s1232_s10 = smov 0  }
   0x2   :  { %s1234_s11 = smov 0   ;;  %s1236_s12 = smov 0  }
   0x3   :  { %s1238_s13 = smov 0   ;;  %s1240_s14 = smov 0  }
   0x4 LB: > { %s929_s15 = sadd.s32 4294967295, %s1211_s14   ;;  %s930_s16 = sadd.s32 4294967294, %s1211_s14   ;;  %s1211_s14 = sphi %s1240_s14, %s15_s14   ;;  %s1207_s13 = sphi %s1238_s13, %s1672_s13   ;;  %s1203_s12 = sphi %s1236_s12, %s1671_s12   ;;  %s1199_s11 = sphi %s1234_s11, %s1670_s11   ;;  %s1195_s10 = sphi %s1232_s10, %s1669_s10   ;;  %s1191_s9 = sphi %s1230_s9, %s1668_s9  }
   0x5   : > { %s27_s17 = sadd.s32 1, %s1207_s13  ;;  %s83_s18 = sadd.s32 1, %s1199_s11 }
   0x6   : > { %p29_p0 = scmp.ge.s32.totalorder %s27_s17, 2  ;;  %p93_p1 = scmp.ne.s32.totalorder %s1199_s11, %s1195_s10 }
   0x7   : > { %p94_p2 = scmp.eq.s32.totalorder %s929_s15, 1  ;;  %p99_p3 = scmp.ne.s32.totalorder %s1195_s10, %s1191_s9 }
   0x8   : > { %s1674_s17 = smov (%p29_p0, %s27_s17), 0  ;;  %p100_p5 = scmp.eq.s32.totalorder %s930_s16, 1 }
   0x9   : > { %p1270_p4 = por %p94_p2, %p93_p1  ;;  %s80_s20 = ssub.s32 %s1207_s13, %s1674_s17 }
   0xa   : > { %p933_p6 = scmp.ge.s32.totalorder %s1211_s14, 1  ;;  %p81_p7 = scmp.eq.s32.totalorder %s80_s20, 0 }
   0xb   : > { %p1277_p8 = por %p100_p5, %p99_p3  ;;  %p132_p9 = scmp.lt.s32.totalorder %s1211_s14, 3 }
   0xc   : > { %s1283_s22 = scalar_select %p81_p7, %s1199_s11, %s83_s18  }
   0xd   : > { %p133_p10 = pnand %p933_p6, %p132_p9 }
   0xe   : > { %s156_s25 = smul.u32 (!%p133_p10), 20, %s1203_s12  ;;  %s152_s26 = sand.u32 (!%p133_p10), 1, %s1195_s10  }
   0xf   : > { %136 = sbr.rel (%p133_p10) target bundleno = 363 (0x16b), region = 28  ;;  %s934_s27 = sshll.u32 (!%p133_p10), %s152_s26, 3 }
  0x10   : > { %p157_p11 = scmp.lt.s32.totalorder (!%p133_p10), %s156_s25, 39  ;;  %s965_s28 = sshll.u32 (!%p133_p10), %s1203_s12, 7 }
  0x11   : > { %s154_s29 = scalar_lea.vmem (!%p133_p10), [#allocation2], %s934_s27  ;;  %s860_s5 = scalar_lea.hbm (!%p133_p10), %s1665_s2, %s965_s28 }
  0x12   : > { %s862_s30 = sshll.u32 (!%p133_p10), %s154_s29, 4  ;;  %s1214_s8 = smov (!%p133_p10), [#allocation2]   ;;  %s863_s30 = int_to_ptr.vmem [resolvable:$true] %s862_s30 }
  0x13   : > { %s1135_s7 = scalar_lea.vmem (!%p133_p10), %s863_s30, 128  ;;  %s1139_s15 = sshll.u32 (!%p133_p10), %s1214_s8, 4  ;;  %s1140_s15 = int_to_ptr.vmem [resolvable:$false] %s1139_s15 }
  0x14   : > { %v1033_v0 = vld [vmem:[%s1664_s1 + $0x34] ss:$8 sps:$4 sm:$0xff]   ;;  %v1035_v1 = vld [vmem:[%s1664_s1 + $0x30] ss:$8 sps:$4 sm:$0xff]   ;;  %v1213_v2 = vmov 0   ;;  %s1676_s25 = smov (!%p157_p11, %s156_s25), 39  ;;  %p1136_p12 = scmp.ne.s32.totalorder %s863_s30, %s1135_s7 }
  0x15   : > { %350 = vmatprep.mubr.bf16.mxu0 %v1213_v2  ;;  %400 = vmatprep.mubr.bf16.mxu1 %v1213_v2  ;;  %v1036_v3 = vld [vmem:[%s1664_s1 + $0x24] ss:$8 sps:$4 sm:$0xff]   ;;  %v1038_v4 = vld [vmem:[%s1664_s1 + $0x20] ss:$8 sps:$4 sm:$0xff]   ;;  %v1039_v5 = vld [vmem:[%s1664_s1 + $0x14] ss:$8 sps:$4 sm:$0xff]   ;;  %p1142_p1 = scmp.lt.s32.totalorder %s863_s30, %s1140_s15 }
  0x16   : > { %326 = vmatprep.subr.bf16.mxu0 %v1033_v0  ;;  %968 = vmatprep.subr.bf16.mxu1 %v1033_v0  ;;  %s935_s6 = sshll.u32 %s1676_s25, 2  ;;  %v1041_v6 = vld [vmem:[%s1664_s1 + $0x10] ss:$8 sps:$4 sm:$0xff]   ;;  %v1042_v7 = vld [vmem:[%s1664_s1 + $0x4] ss:$8 sps:$4 sm:$0xff]   ;;  %vm287_vm0 = vcmask 523264   ;;  %p1137_p13 = pnand %p1136_p12, %p1270_p4 }
  0x17   : > { %327 = vmatpush1.bf16.msra.mxu0 %v1035_v1  ;;  %972 = vmatpush1.bf16.msra.mxu1 %v1035_v1  ;;  %s1307_s18 = scalar_lea.vmem %s1663_s0, %s935_s6  ;;  %v1044_v8 = vld [vmem:[%s1664_s1] ss:$8 sps:$4 sm:$0xff]   ;;  %s849_s6 = scalar_lea.sflag [#allocation3], %s152_s26 }
  0x18   : > { %328 = vmatprep.subr.bf16.mxu0 %v1036_v3  ;;  %969 = vmatprep.subr.bf16.mxu1 %v1036_v3  ;;  %v1045_v9 = vld [vmem:[%s1307_s18] sm:$0xff]   ;;  %v1046_v10 = vld [vmem:[%s1307_s18 + $0x28] sm:$0xff]   ;;  %v1048_v12 = vld [vmem:[%s1307_s18 + $0x30] sm:$0xff]   ;;  %p1138_p0 = pneg %p1137_p13  ;;  %s1141_s12 = scalar_lea.vmem %s1140_s15, 256 }
  0x19   : > { %v1047_v11 = vld [vmem:[%s1307_s18 + $0x8] sm:$0xff]   ;;  %v1049_v13 = vld [vmem:[%s1307_s18 + $0x10] sm:$0xff]   ;;  %v1050_v14 = vld [vmem:[%s1307_s18 + $0x38] sm:$0xff]   ;;  %p1143_p2 = scmp.lt.s32.totalorder %s1141_s12, %s1135_s7 }
  0x1a   : > { %v1051_v15 = vld [vmem:[%s1307_s18 + $0x18] sm:$0xff]   ;;  %v1052_v16 = vld [vmem:[%s1307_s18 + $0x40] sm:$0xff]   ;;  %v1054_v18 = vld [vmem:[%s1307_s18 + $0x48] sm:$0xff]  }
  0x1b   : > { %329 = vmatpush1.bf16.msra.mxu0 %v1038_v4  ;;  %973 = vmatpush1.bf16.msra.mxu1 %v1038_v4  ;;  %v1053_v17 = vld [vmem:[%s1307_s18 + $0x20] sm:$0xff]   ;;  %p1144_p3 = por %p1143_p2, %p1142_p1 }
  0x1c   : > { %330 = vmatprep.subr.bf16.mxu0 %v1039_v5  ;;  %970 = vmatprep.subr.bf16.mxu1 %v1039_v5 }
  0x1d   : > { %p1145_p5 = pnand %p1144_p3, %p1138_p0 }
  0x1f   : > { %331 = vmatpush1.bf16.msra.mxu0 %v1041_v6  ;;  %974 = vmatpush1.bf16.msra.mxu1 %v1041_v6 }
  0x20   : > { %332 = vmatprep.subr.bf16.mxu0 %v1042_v7  ;;  %971 = vmatprep.subr.bf16.mxu1 %v1042_v7 }
  0x23   : > { %333 = vmatpush1.bf16.msra.mxu0 %v1044_v8  ;;  %975 = vmatpush1.bf16.msra.mxu1 %v1044_v8 }
  0x26   : > { %954 = vmatmul.mubr.msk.bf16.vlgmr.msra.gmra.mxu0 %vm287_vm0, %v1045_v9  ;;  %959 = vmatmul.mubr.msk.bf16.vlgmr.msra.gmra.mxu1 %vm287_vm0, %v1046_v10 }
  0x27   : > { %360 = vmatprep.mubr.bf16.mxu0 %v1213_v2  ;;  %410 = vmatprep.mubr.bf16.mxu1 %v1213_v2 }
  0x2e   : > { %955 = vmatmul.mubr.msk.bf16.gmra.mxu0 %vm287_vm0, %v1047_v11  ;;  %960 = vmatmul.mubr.msk.bf16.gmra.mxu1 %vm287_vm0, %v1048_v12 }
  0x2f   : > { %370 = vmatprep.mubr.bf16.mxu0 %v1213_v2  ;;  %420 = vmatprep.mubr.bf16.mxu1 %v1213_v2 }
  0x36   : > { %956 = vmatmul.mubr.msk.bf16.gmra.mxu0 %vm287_vm0, %v1049_v13  ;;  %961 = vmatmul.mubr.msk.bf16.gmra.mxu1 %vm287_vm0, %v1050_v14 }
  0x37   : > { %380 = vmatprep.mubr.bf16.mxu0 %v1213_v2  ;;  %430 = vmatprep.mubr.bf16.mxu1 %v1213_v2 }
  0x3e   : > { %957 = vmatmul.mubr.msk.bf16.gmra.mxu0 %vm287_vm0, %v1051_v15  ;;  %962 = vmatmul.mubr.msk.bf16.gmra.mxu1 %vm287_vm0, %v1052_v16 }
  0x3f   : > { %390 = vmatprep.mubr.bf16.mxu0 %v1213_v2  ;;  %440 = vmatprep.mubr.bf16.mxu1 %v1213_v2 }
  0x46   : > { %958 = vmatmul.mubr.msk.bf16.gmra.mxu0 %vm287_vm0, %v1053_v17  ;;  %963 = vmatmul.mubr.msk.bf16.gmra.mxu1 %vm287_vm0, %v1054_v18 }
  0xe6   : > { %v352_v19 = vpop.f32.mrf.mxu0  ;;  %v402_v20 = vpop.f32.mrf.mxu1 }
  0xe7   : > { %v451_v27 = vmul.f32 %v352_v19, %v352_v19  ;;  %v561_v28 = vmul.f32 %v402_v20, %v402_v20 }
  0xe8   : > { %v354_v21 = vpop.f32.mrf.mxu0  ;;  %v404_v22 = vpop.f32.mrf.mxu1 }
  0xe9   : > { %v461_v23 = vmul.f32 %v354_v21, %v354_v21  ;;  %v571_v24 = vmul.f32 %v404_v22, %v404_v22 }
  0xea   : > { %v356_v25 = vpop.f32.mrf.mxu0  ;;  %v406_v26 = vpop.f32.mrf.mxu1 }
  0xeb   : > { %v471_v31 = vadd.f32 %v461_v23, %v451_v27  ;;  %v581_v32 = vadd.f32 %v571_v24, %v561_v28  ;;  %v452_v41 = vmul.f32 %v356_v25, %v356_v25  ;;  %v562_v44 = vmul.f32 %v406_v26, %v406_v26 }
  0xec   : > { %v358_v29 = vpop.f32.mrf.mxu0  ;;  %v408_v30 = vpop.f32.mrf.mxu1 }
  0xed   : > { %v462_v35 = vmul.f32 %v358_v29, %v358_v29  ;;  %v1335_v38 = vmax.f32 %v471_v31, 1e-08  ;;  %v572_v39 = vmul.f32 %v408_v30, %v408_v30  ;;  %v1337_v40 = vmax.f32 %v581_v32, 1e-08 }
  0xee   : > { %v362_v33 = vpop.f32.mrf.mxu0  ;;  %v412_v34 = vpop.f32.mrf.mxu1 }
  0xef   : > { %v472_v46 = vadd.f32 %v462_v35, %v452_v41  ;;  %v453_v47 = vmul.f32 %v362_v33, %v362_v33  ;;  %1055 = vrsqrt.f32 %v1335_v38  ;;  %v582_v48 = vadd.f32 %v572_v39, %v562_v44 }
  0xf0   : > { %v364_v36 = vpop.f32.mrf.mxu0  ;;  %v414_v37 = vpop.f32.mrf.mxu1  ;;  %v563_v49 = vmul.f32 %v412_v34, %v412_v34  ;;  %1057 = vrsqrt.f32 %v1337_v40  ;;  %vm493_vm1 = vcmp.eq.f32.partialorder %v1335_v38, inf  ;;  %vm603_vm2 = vcmp.eq.f32.partialorder %v1337_v40, inf }
  0xf1   : > { %v463_v42 = vmul.f32 %v364_v36, %v364_v36  ;;  %v573_v45 = vmul.f32 %v414_v37, %v414_v37  ;;  %v1341_v54 = vmax.f32 %v472_v46, 1e-08  ;;  %v1343_v55 = vmax.f32 %v582_v48, 1e-08 }
  0xf2   : > { %v366_v43 = vpop.f32.mrf.mxu0  ;;  %v416_v52 = vpop.f32.mrf.mxu1  ;;  %v496_v22 = vand.u32 2147483648, %v1335_v38  ;;  %vm495_vm3 = vcmp.eq.f32.partialorder %v1335_v38, 0.0  ;;  %vm605_vm4 = vcmp.eq.f32.partialorder %v1337_v40, 0.0  ;;  %v606_v27 = vand.u32 2147483648, %v1337_v40 }
  0xf3   : > { %v473_v51 = vadd.f32 %v463_v42, %v453_v47  ;;  %v583_v53 = vadd.f32 %v573_v45, %v563_v49  ;;  %1059 = vrsqrt.f32 %v1341_v54  ;;  %v454_v0 = vmul.f32 %v366_v43, %v366_v43 }
  0xf4   : > { %v368_v50 = vpop.f32.mrf.mxu0  ;;  %v418_v58 = vpop.f32.mrf.mxu1  ;;  %1061 = vrsqrt.f32 %v1343_v55  ;;  %v564_v1 = vmul.f32 %v416_v52, %v416_v52  ;;  %vm500_vm5 = vcmp.eq.f32.partialorder %v1341_v54, inf  ;;  %vm502_vm6 = vcmp.eq.f32.partialorder %v1341_v54, 0.0 }
  0xf5   : > { %v1345_v57 = vmax.f32 %v473_v51, 1e-08  ;;  %v1347_v59 = vmax.f32 %v583_v53, 1e-08  ;;  %v464_v60 = vmul.f32 %v368_v50, %v368_v50  ;;  %v574_v62 = vmul.f32 %v418_v58, %v418_v58 }
  0xf6   : > { %v372_v56 = vpop.f32.mrf.mxu0  ;;  %v422_v63 = vpop.f32.mrf.mxu1  ;;  %v503_v37 = vand.u32 2147483648, %v1341_v54  ;;  %vm610_vm7 = vcmp.eq.f32.partialorder %v1343_v55, inf  ;;  %vm612_vm8 = vcmp.eq.f32.partialorder %v1343_v55, 0.0  ;;  %v613_v46 = vand.u32 2147483648, %v1343_v55 }
  0xf7   : > { %1063 = vrsqrt.f32 %v1345_v57  ;;  %v474_v2 = vadd.f32 %v464_v60, %v454_v0  ;;  %v584_v5 = vadd.f32 %v574_v62, %v564_v1  ;;  %v455_v15 = vmul.f32 %v372_v56, %v372_v56 }
  0xf8   : > { %v374_v61 = vpop.f32.mrf.mxu0  ;;  %1065 = vrsqrt.f32 %v1347_v59  ;;  %v424_v6 = vpop.f32.mrf.mxu1  ;;  %v565_v24 = vmul.f32 %v422_v63, %v422_v63  ;;  %vm507_vm9 = vcmp.eq.f32.partialorder %v1345_v57, inf  ;;  %vm509_vm10 = vcmp.eq.f32.partialorder %v1345_v57, 0.0 }
  0xf9   : > { %v1354_v9 = vmax.f32 %v474_v2, 1e-08  ;;  %v465_v10 = vmul.f32 %v374_v61, %v374_v61  ;;  %v1357_v13 = vmax.f32 %v584_v5, 1e-08  ;;  %v575_v16 = vmul.f32 %v424_v6, %v424_v6 }
  0xfa   : > { %v376_v3 = vpop.f32.mrf.mxu0  ;;  %v426_v14 = vpop.f32.mrf.mxu1  ;;  %vm617_vm11 = vcmp.eq.f32.partialorder %v1347_v59, inf  ;;  %v510_v53 = vand.u32 2147483648, %v1345_v57  ;;  %v620_v60 = vand.u32 2147483648, %v1347_v59  ;;  %vm619_vm12 = vcmp.eq.f32.partialorder %v1347_v59, 0.0 }
  0xfb   : > { %1067 = vrsqrt.f32 %v1354_v9  ;;  %v475_v19 = vadd.f32 %v465_v10, %v455_v15  ;;  %v585_v31 = vadd.f32 %v575_v16, %v565_v24  ;;  %v456_v41 = vmul.f32 %v376_v3, %v376_v3 }
  0xfc   : > { %v1056_v4 = vpop.eup %1055  ;;  %v378_v11 = vpop.f32.mrf.mxu0  ;;  %1069 = vrsqrt.f32 %v1357_v13  ;;  %v566_v49 = vmul.f32 %v426_v14, %v426_v14  ;;  %vm514_vm13 = vcmp.eq.f32.partialorder %v1354_v9, inf  ;;  %vm624_vm14 = vcmp.eq.f32.partialorder %v1357_v13, inf }
  0xfd   : > { %v1058_v7 = vpop.eup %1057  ;;  %v492_v8 = vmul.f32 %v1056_v4, %v1335_v38  ;;  %v428_v25 = vpop.f32.mrf.mxu1  ;;  %v1374_v34 = vmax.f32 %v475_v19, 1e-08  ;;  %v466_v35 = vmul.f32 %v378_v11, %v378_v11  ;;  %v1385_v43 = vmax.f32 %v585_v31, 1e-08 }
  0xfe   : > { %v602_v12 = vmul.f32 %v1058_v7, %v1337_v40  ;;  %v1363_v20 = vpop.f32.mrf.mxu0  ;;  %v576_v44 = vmul.f32 %v428_v25, %v428_v25  ;;  %vm516_vm15 = vcmp.eq.f32.partialorder %v1354_v9, 0.0  ;;  %vm626_vm0 = vcmp.eq.f32.partialorder %v1357_v13, 0.0 }
  0xff   : > { %v494_v18 = vsel %vm493_vm1, %v1335_v38, %v492_v8  ;;  %v432_v38 = vpop.f32.mrf.mxu1  ;;  %v476_v47 = vadd.f32 %v466_v35, %v456_v41  ;;  %vm521_vm1 = vcmp.eq.f32.partialorder %v1374_v34, inf  ;;  %v634_v41 = vand.u32 2147483648, %v1385_v43 }
 0x100   : > { %v1060_v17 = vpop.eup %1059  ;;  %v604_v23 = vsel %vm603_vm2, %v1337_v40, %v602_v12  ;;  %v497_v29 = vsel %vm495_vm3, %v496_v22, %v494_v18  ;;  %v384_v36 = vpop.f32.mrf.mxu0  ;;  %v586_v61 = vadd.f32 %v576_v44, %v566_v49  ;;  %v567_v7 = vmul.f32 %v432_v38, %v432_v38 }
 0x101   : > { %v1062_v21 = vpop.eup %1061  ;;  %v499_v30 = vmul.f32 %v1060_v17, %v1341_v54  ;;  %v607_v32 = vsel %vm605_vm4, %v606_v27, %v604_v23  ;;  %1071 = vlog2.f32 %v497_v29  ;;  %v434_v50 = vpop.f32.mrf.mxu1  ;;  %v1407_v62 = vmax.f32 %v476_v47, 1e-08 }
 0x102   : > { %v609_v33 = vmul.f32 %v1062_v21, %v1343_v55  ;;  %1073 = vlog2.f32 %v607_v32  ;;  %v1390_v48 = vpop.f32.mrf.mxu0  ;;  %v467_v5 = vmul.f32 %v384_v36, %v384_v36  ;;  %v1418_v6 = vmax.f32 %v586_v61, 1e-08 }
 0x103   : > { %v501_v42 = vsel %vm500_vm5, %v1341_v54, %v499_v30  ;;  %1075 = vrsqrt.f32 %v1374_v34  ;;  %v517_v54 = vand.u32 2147483648, %v1354_v9  ;;  %v1414_v2 = vpop.f32.mrf.mxu1  ;;  %v577_v8 = vmul.f32 %v434_v50, %v434_v50 }
 0x104   : > { %v1064_v26 = vpop.eup %1063  ;;  %v611_v45 = vsel %vm610_vm7, %v1343_v55, %v609_v33  ;;  %v504_v51 = vsel %vm502_vm6, %v503_v37, %v501_v42  ;;  %1077 = vrsqrt.f32 %v1385_v43  ;;  %v1409_v63 = vpop.f32.mrf.mxu0  ;;  %v707_v10 = vmul.f32 %v607_v32, %v607_v32 }
 0x105   : > { %v1066_v28 = vpop.eup %1065  ;;  %v506_v39 = vmul.f32 %v1064_v26, %v1345_v57  ;;  %v614_v58 = vsel %vm612_vm8, %v613_v46, %v611_v45  ;;  %1079 = vlog2.f32 %v504_v51  ;;  %v627_v12 = vand.u32 2147483648, %v1357_v13  ;;  %v438_v19 = vpop.f32.mrf.mxu1 }
 0x106   : > { %v616_v40 = vmul.f32 %v1066_v28, %v1347_v59  ;;  %v672_v4 = vsub.f32 %v614_v58, %v504_v51  ;;  %1081 = vlog2.f32 %v614_v58  ;;  %v1424_v14 = vpop.f32.mrf.mxu0  ;;  %v587_v18 = vadd.f32 %v577_v8, %v567_v7 }
 0x107   : > { %v508_v52 = vsel %vm507_vm9, %v1345_v57, %v506_v39  ;;  %v457_v57 = vmul.f32 %v1363_v20, %v1363_v20  ;;  %1083 = vrsqrt.f32 %v1407_v62  ;;  %v708_v23 = vmul.f32 %v614_v58, %v614_v58  ;;  %v442_v38 = vpop.f32.mrf.mxu1 }
 0x108   : > { %v618_v56 = vsel %vm617_vm11, %v1347_v59, %v616_v40  ;;  %v1068_v0 = vpop.eup %1067  ;;  %v511_v55 = vsel %vm509_vm10, %v510_v53, %v508_v52  ;;  %v671_v59 = vsub.f32 %v607_v32, %v497_v29  ;;  %v682_v20 = vmul.f32 %v672_v4, %v672_v4  ;;  %v394_v31 = vpop.f32.mrf.mxu0 }
 0x109   : > { %v621_v1 = vsel %vm619_vm12, %v620_v60, %v618_v56  ;;  %v1070_v3 = vpop.eup %1069  ;;  %v513_v15 = vmul.f32 %v1068_v0, %v1354_v9  ;;  %v477_v17 = vadd.f32 %v467_v5, %v457_v57  ;;  %v810_v25 = vand.u32 2147483647, %v672_v4  ;;  %v444_v60 = vpop.f32.mrf.mxu1 }
 0x10a   : > { %v673_v11 = vsub.f32 %v621_v1, %v511_v55  ;;  %v623_v16 = vmul.f32 %v1070_v3, %v1357_v13  ;;  %v681_v21 = vmul.f32 %v671_v59, %v671_v59  ;;  %v809_v22 = vand.u32 2147483647, %v671_v59  ;;  %v396_v51 = vpop.f32.mrf.mxu0 }
 0x10b   : > { %1085 = vrsqrt.f32 %v1418_v6  ;;  %v1430_v26 = vmax.f32 %v477_v17, 1e-08  ;;  %v709_v28 = vmul.f32 %v621_v1, %v621_v1  ;;  %v524_v29 = vand.u32 2147483648, %v1374_v34 }
 0x10c   : > { %1087 = vlog2.f32 %v511_v55  ;;  %v1433_v30 = vmax.f32 %v587_v18, 1e-08  ;;  %v683_v33 = vmul.f32 %v673_v11, %v673_v11  ;;  %v811_v35 = vand.u32 2147483647, %v673_v11  ;;  %v398_v57 = vpop.f32.mrf.mxu0 }
 0x10d   : > { %v515_v36 = vsel %vm514_vm13, %v1354_v9, %v513_v15  ;;  %v625_v37 = vsel %vm624_vm14, %v1357_v13, %v623_v16  ;;  %v691_v39 = vadd.f32 %v682_v20, %v681_v21  ;;  %v717_v40 = vadd.f32 %v708_v23, %v707_v10 }
 0x10e   : > { %v1072_v24 = vpop.eup %1071  ;;  %1089 = vlog2.f32 %v621_v1  ;;  %vm631_vm2 = vcmp.eq.f32.partialorder %v1385_v43, inf  ;;  %v819_v45 = vadd.f32 %v810_v25, %v809_v22  ;;  %vm523_vm3 = vcmp.eq.f32.partialorder %v1374_v34, 0.0 }
 0x10f   : > { %v1074_v27 = vpop.eup %1073  ;;  %v734_v42 = vmul.f32 0.6931472, %v1072_v24  ;;  %1091 = vrsqrt.f32 %v1430_v26  ;;  %v518_v47 = vsel %vm516_vm15, %v517_v54, %v515_v36  ;;  %v628_v49 = vsel %vm626_vm0, %v627_v12, %v625_v37  ;;  %v446_v12 = vpop.f32.mrf.mxu1 }
 0x110   : > { %v1076_v32 = vpop.eup %1075  ;;  %v754_v44 = vmul.f32 0.6931472, %v1074_v27  ;;  %1093 = vrsqrt.f32 %v1433_v30  ;;  %v1453_v52 = vadd.f32 %v691_v39, %v683_v33  ;;  %v718_v53 = vadd.f32 %v717_v40, %v709_v28 }
 0x111   : > { %v1078_v46 = vpop.eup %1077  ;;  %v520_v50 = vmul.f32 %v1076_v32, %v1374_v34  ;;  %v1455_v56 = vadd.f32 %v819_v45, %v811_v35  ;;  %vm633_vm4 = vcmp.eq.f32.partialorder %v1385_v43, 0.0  ;;  %v531_v58 = vand.u32 2147483648, %v1407_v62 }
 0x112   : > { %v1080_v9 = vpop.eup %1079  ;;  %v458_v13 = vmul.f32 %v1390_v48, %v1390_v48  ;;  %v568_v61 = vmul.f32 %v1414_v2, %v1414_v2  ;;  %v468_v54 = vmul.f32 %v1409_v63, %v1409_v63  ;;  %v578_v0 = vmul.f32 %v438_v19, %v438_v19 }
 0x113   : > { %v1082_v55 = vpop.eup %1081  ;;  %v773_v1 = vsub.f32 %v734_v42, %v754_v44  ;;  %1095 = vlog2.f32 %v518_v47  ;;  %v1465_v3 = vsub.f32 %v628_v49, %v518_v47  ;;  %v630_v59 = vmul.f32 %v1078_v46, %v1385_v43 }
 0x114   : > { %v710_v4 = vmul.f32 %v628_v49, %v628_v49  ;;  %v522_v5 = vsel %vm521_vm1, %v1374_v34, %v520_v50  ;;  %vm528_vm5 = vcmp.eq.f32.partialorder %v1407_v62, inf  ;;  %v478_v48 = vadd.f32 %v468_v54, %v458_v13  ;;  %v1084_v7 = vpop.eup %1083 }
 0x115   : > { %v588_v2 = vadd.f32 %v578_v0, %v568_v61  ;;  %v459_v63 = vmul.f32 %v1424_v14, %v1424_v14  ;;  %v569_v8 = vmul.f32 %v442_v38, %v442_v38  ;;  %v469_v10 = vmul.f32 %v394_v31, %v394_v31  ;;  %v448_v31 = vpop.f32.mrf.mxu1 }
 0x116   : > { %v579_v11 = vmul.f32 %v444_v60, %v444_v60  ;;  %1097 = vlog2.f32 %v628_v49  ;;  %vm638_vm6 = vcmp.eq.f32.partialorder %v1418_v6, inf  ;;  %v1475_v15 = vmax.f32 %v478_v48, 1e-08 }
 0x117   : > { %v1477_v16 = vmax.f32 %v588_v2, 1e-08  ;;  %v632_v17 = vsel %vm631_vm2, %v1385_v43, %v630_v59  ;;  %vm530_vm7 = vcmp.eq.f32.partialorder %v1407_v62, 0.0  ;;  %v479_v18 = vadd.f32 %v469_v10, %v459_v63 }
 0x118   : > { %v589_v19 = vadd.f32 %v579_v11, %v569_v8  ;;  %v470_v14 = vmul.f32 %v398_v57, %v398_v57  ;;  %v1086_v21 = vpop.eup %1085  ;;  %v736_v22 = vmul.f32 0.6931472, %v1080_v9  ;;  %v756_v20 = vmul.f32 0.6931472, %v1082_v55 }
 0x119   : > { %v525_v23 = vsel %vm523_vm3, %v524_v29, %v522_v5  ;;  %1099 = vrsqrt.f32 %v1475_v15  ;;  %v1088_v24 = vpop.eup %1087  ;;  %v1488_v25 = vand.u32 2147483647, %v773_v1  ;;  %v527_v27 = vmul.f32 %v1084_v7, %v1407_v62 }
 0x11a   : > { %vm640_vm8 = vcmp.eq.f32.partialorder %v1418_v6, 0.0  ;;  %1101 = vrsqrt.f32 %v1477_v16  ;;  %v460_v28 = vmul.f32 %v396_v51, %v396_v51  ;;  %v684_v32 = vmul.f32 %v1465_v3, %v1465_v3 }
 0x11b   : > { %v719_v33 = vadd.f32 %v718_v53, %v710_v4  ;;  %v635_v34 = vsel %vm633_vm4, %v634_v41, %v632_v17  ;;  %v1499_v29 = vmax.f32 %v479_v18, 1e-08  ;;  %v1090_v35 = vpop.eup %1089  ;;  %1103 = vlog2.f32 %v525_v23 }
 0x11c   : > { %v637_v36 = vmul.f32 %v1086_v21, %v1418_v6  ;;  %v1502_v37 = vmax.f32 %v589_v19, 1e-08  ;;  %v480_v38 = vadd.f32 %v470_v14, %v460_v28  ;;  %v1092_v39 = vpop.eup %1091  ;;  %v774_v40 = vsub.f32 %v736_v22, %v756_v20 }
 0x11d   : > { %v812_v42 = vand.u32 2147483647, %v1465_v3  ;;  %1105 = vrsqrt.f32 %v1499_v29  ;;  %v580_v44 = vmul.f32 %v448_v31, %v448_v31  ;;  %v1094_v45 = vpop.eup %1093  ;;  %v1506_v46 = vsub.f32 %v635_v34, %v525_v23 }
 0x11e   : > { %v711_v43 = vmul.f32 %v635_v34, %v635_v34  ;;  %v529_v41 = vsel %vm528_vm5, %v1407_v62, %v527_v27  ;;  %1107 = vrsqrt.f32 %v1502_v37  ;;  %v1512_v47 = vmul.f32 0.6931472, %v1088_v24 }
 0x11f   : > { %1109 = vlog2.f32 %v635_v34  ;;  %v641_v49 = vand.u32 2147483648, %v1418_v6  ;;  %v570_v50 = vmul.f32 %v446_v12, %v446_v12  ;;  %v1515_v51 = vmul.f32 0.6931472, %v1090_v35 }
 0x120   : > { %v639_v53 = vsel %vm638_vm6, %v1418_v6, %v637_v36  ;;  %v534_v60 = vmul.f32 %v1092_v39, %v1430_v26  ;;  %v1521_v9 = vmax.f32 %v480_v38, 1e-08  ;;  %v1096_v13 = vpop.eup %1095  ;;  %v1524_v61 = vadd.f32 %v1453_v52, %v684_v32 }
 0x121   : > { %v532_v54 = vsel %vm530_vm7, %v531_v58, %v529_v41  ;;  %v644_v0 = vmul.f32 %v1094_v45, %v1433_v30  ;;  %v590_v55 = vadd.f32 %v580_v44, %v570_v50  ;;  %v1531_v1 = vand.u32 2147483647, %v774_v40 }
 0x122   : > { %v1534_v3 = vadd.f32 %v1455_v56, %v812_v42  ;;  %v1538_v59 = vmul.f32 %v1506_v46, %v1506_v46  ;;  %v1540_v4 = vadd.f32 %v719_v33, %v711_v43  ;;  %v813_v52 = vand.u32 2147483647, %v1506_v46 }
 0x123   : > { %v1545_v62 = vsel %vm640_vm8, %v641_v49, %v639_v53  ;;  %vm535_vm9 = vcmp.eq.f32.partialorder %v1430_v26, inf  ;;  %1111 = vrsqrt.f32 %v1521_v9  ;;  %v1098_v58 = vpop.eup %1097  ;;  %v775_v56 = vsub.f32 %v1512_v47, %v1515_v51 }
 0x124   : > { %1113 = vlog2.f32 %v532_v54  ;;  %v536_v5 = vsel %vm535_vm9, %v1430_v26, %v534_v60  ;;  %vm645_vm10 = vcmp.eq.f32.partialorder %v1433_v30, inf  ;;  %vm537_vm11 = vcmp.eq.f32.partialorder %v1430_v26, 0.0 }
 0x125   : > { %v538_v48 = vand.u32 2147483648, %v1430_v26  ;;  %v646_v6 = vsel %vm645_vm10, %v1433_v30, %v644_v0  ;;  %v1556_v2 = vmax.f32 %v590_v55, 1e-08  ;;  %v1558_v7 = vmul.f32 0.6931472, %v1096_v13 }
 0x126   : > { %v1100_v57 = vpop.eup %1099  ;;  %1115 = vlog2.f32 %v1545_v62  ;;  %vm647_vm12 = vcmp.eq.f32.partialorder %v1433_v30, 0.0  ;;  %v648_v63 = vand.u32 2147483648, %v1433_v30  ;;  %v1563_v10 = vmul.f32 0.6931472, %v1098_v58 }
 0x127   : > { %v1102_v8 = vpop.eup %1101  ;;  %v539_v11 = vsel %vm537_vm11, %v538_v48, %v536_v5  ;;  %v541_v12 = vmul.f32 %v1100_v57, %v1475_v15  ;;  %1117 = vrsqrt.f32 %v1556_v2  ;;  %vm542_vm13 = vcmp.eq.f32.partialorder %v1475_v15, inf }
 0x128   : > { %v1567_v26 = vsel %vm647_vm12, %v648_v63, %v646_v6  ;;  %v545_v17 = vand.u32 2147483648, %v1475_v15  ;;  %v651_v18 = vmul.f32 %v1102_v8, %v1477_v16  ;;  %v1104_v19 = vpop.eup %1103  ;;  %vm544_vm14 = vcmp.eq.f32.partialorder %v1475_v15, 0.0 }
 0x129   : > { %v543_v14 = vsel %vm542_vm13, %v1475_v15, %v541_v12  ;;  %vm652_vm15 = vcmp.eq.f32.partialorder %v1477_v16, inf  ;;  %v655_v30 = vand.u32 2147483648, %v1477_v16  ;;  %1119 = vlog2.f32 %v539_v11 }
 0x12a   : > { %v1106_v21 = vpop.eup %1105  ;;  %v546_v22 = vsel %vm544_vm14, %v545_v17, %v543_v14  ;;  %v653_v20 = vsel %vm652_vm15, %v1477_v16, %v651_v18  ;;  %vm654_vm0 = vcmp.eq.f32.partialorder %v1477_v16, 0.0  ;;  %1121 = vlog2.f32 %v1567_v26 }
 0x12b   : > { %v1108_v23 = vpop.eup %1107  ;;  %v1579_v24 = vsel %vm654_vm0, %v655_v30, %v653_v20  ;;  %v548_v27 = vmul.f32 %v1106_v21, %v1499_v29  ;;  %vm549_vm1 = vcmp.eq.f32.partialorder %v1499_v29, inf  ;;  %1123 = vlog2.f32 %v546_v22 }
 0x12c   : > { %v1110_v15 = vpop.eup %1109  ;;  %vm551_vm2 = vcmp.eq.f32.partialorder %v1499_v29, 0.0  ;;  %v552_v28 = vand.u32 2147483648, %v1499_v29  ;;  %v658_v31 = vmul.f32 %v1108_v23, %v1502_v37  ;;  %1125 = vlog2.f32 %v1579_v24 }
 0x12d   : > { %v550_v16 = vsel %vm549_vm1, %v1499_v29, %v548_v27  ;;  %vm659_vm3 = vcmp.eq.f32.partialorder %v1502_v37, inf  ;;  %v662_v32 = vand.u32 2147483648, %v1502_v37  ;;  %v676_v33 = vsub.f32 %v1545_v62, %v532_v54 }
 0x12e   : > { %v553_v34 = vsel %vm551_vm2, %v552_v28, %v550_v16  ;;  %v660_v35 = vsel %vm659_vm3, %v1502_v37, %v658_v31  ;;  %vm661_vm4 = vcmp.eq.f32.partialorder %v1502_v37, 0.0  ;;  %v742_v36 = vmul.f32 0.6931472, %v1104_v19 }
 0x12f   : > { %v762_v38 = vmul.f32 0.6931472, %v1110_v15  ;;  %1127 = vlog2.f32 %v553_v34  ;;  %v663_v39 = vsel %vm661_vm4, %v662_v32, %v660_v35  ;;  %v793_v42 = vadd.f32 %v1531_v1, %v1488_v25 }
 0x130   : > { %v1112_v40 = vpop.eup %1111  ;;  %v694_v29 = vadd.f32 %v1524_v61, %v1538_v59  ;;  %v677_v44 = vsub.f32 %v1567_v26, %v539_v11  ;;  %1129 = vlog2.f32 %v663_v39  ;;  %v776_v43 = vsub.f32 %v1558_v7, %v1563_v10 }
 0x131   : > { %v1114_v45 = vpop.eup %1113  ;;  %v822_v37 = vadd.f32 %v1534_v3, %v813_v52  ;;  %v712_v41 = vmul.f32 %v1545_v62, %v1545_v62  ;;  %v555_v49 = vmul.f32 %v1112_v40, %v1521_v9  ;;  %v814_v25 = vand.u32 2147483647, %v676_v33 }
 0x132   : > { %v678_v50 = vsub.f32 %v1579_v24, %v546_v22  ;;  %vm556_vm5 = vcmp.eq.f32.partialorder %v1521_v9, inf  ;;  %v559_v53 = vand.u32 2147483648, %v1521_v9  ;;  %v785_v13 = vand.u32 2147483647, %v775_v56 }
 0x133   : > { %v1116_v60 = vpop.eup %1115  ;;  %v777_v46 = vsub.f32 %v742_v36, %v762_v38  ;;  %v557_v61 = vsel %vm556_vm5, %v1521_v9, %v555_v49  ;;  %vm558_vm6 = vcmp.eq.f32.partialorder %v1521_v9, 0.0  ;;  %v686_v0 = vmul.f32 %v676_v33, %v676_v33 }
 0x134   : > { %v1118_v54 = vpop.eup %1117  ;;  %v815_v55 = vand.u32 2147483647, %v677_v44  ;;  %v679_v1 = vsub.f32 %v663_v39, %v553_v34  ;;  %v560_v3 = vsel %vm558_vm6, %v559_v53, %v557_v61  ;;  %v786_v59 = vand.u32 2147483647, %v776_v43 }
 0x135   : > { %v721_v52 = vadd.f32 %v1540_v4, %v712_v41  ;;  %1131 = vlog2.f32 %v560_v3  ;;  %v665_v62 = vmul.f32 %v1118_v54, %v1556_v2  ;;  %v823_v58 = vadd.f32 %v822_v37, %v814_v25 }
 0x136   : > { %v816_v5 = vand.u32 2147483647, %v678_v50  ;;  %vm666_vm7 = vcmp.eq.f32.partialorder %v1556_v2, inf  ;;  %v669_v47 = vand.u32 2147483648, %v1556_v2  ;;  %v1120_v51 = vpop.eup %1119  ;;  %v787_v56 = vand.u32 2147483647, %v777_v46 }
 0x137   : > { %v713_v9 = vmul.f32 %v1567_v26, %v1567_v26  ;;  %v667_v48 = vsel %vm666_vm7, %v1556_v2, %v665_v62  ;;  %vm668_vm8 = vcmp.eq.f32.partialorder %v1556_v2, 0.0  ;;  %v1122_v6 = vpop.eup %1121  ;;  %v687_v4 = vmul.f32 %v677_v44, %v677_v44 }
 0x138   : > { %v824_v57 = vadd.f32 %v823_v58, %v815_v55  ;;  %v817_v7 = vand.u32 2147483647, %v679_v1  ;;  %v670_v63 = vsel %vm668_vm8, %v669_v47, %v667_v48  ;;  %v1124_v8 = vpop.eup %1123  ;;  %v744_v10 = vmul.f32 0.6931472, %v1114_v45 }
 0x139   : > { %v764_v11 = vmul.f32 0.6931472, %v1116_v60  ;;  %1133 = vlog2.f32 %v670_v63  ;;  %v680_v12 = vsub.f32 %v670_v63, %v560_v3  ;;  %v1126_v17 = vpop.eup %1125  ;;  %v714_v18 = vmul.f32 %v1579_v24, %v1579_v24 }
 0x13a   : > { %v688_v19 = vmul.f32 %v678_v50, %v678_v50  ;;  %v695_v26 = vadd.f32 %v694_v29, %v686_v0  ;;  %v825_v14 = vadd.f32 %v824_v57, %v816_v5  ;;  %v794_v30 = vadd.f32 %v793_v42, %v785_v13 }
 0x13b   : > { %v746_v21 = vmul.f32 0.6931472, %v1120_v51  ;;  %v766_v2 = vmul.f32 0.6931472, %v1122_v6  ;;  %v818_v22 = vand.u32 2147483647, %v680_v12  ;;  %v722_v23 = vadd.f32 %v721_v52, %v713_v9 }
 0x13c   : > { %v1128_v20 = vpop.eup %1127  ;;  %v715_v27 = vmul.f32 %v663_v39, %v663_v39  ;;  %v696_v15 = vadd.f32 %v695_v26, %v687_v4  ;;  %v826_v28 = vadd.f32 %v825_v14, %v817_v7  ;;  %v778_v16 = vsub.f32 %v744_v10, %v764_v11 }
 0x13d   : > { %v1130_v31 = vpop.eup %1129  ;;  %v748_v32 = vmul.f32 0.6931472, %v1124_v8  ;;  %v768_v33 = vmul.f32 0.6931472, %v1126_v17  ;;  %v689_v34 = vmul.f32 %v679_v1, %v679_v1  ;;  %v716_v36 = vmul.f32 %v670_v63, %v670_v63 }
 0x13e   : > { %v697_v35 = vadd.f32 %v696_v15, %v688_v19  ;;  %v723_v24 = vadd.f32 %v722_v23, %v714_v18  ;;  %v827_v38 = vadd.f32 %v826_v28, %v818_v22  ;;  %v779_v40 = vsub.f32 %v746_v21, %v766_v2 }
 0x13f   : > { %v750_v29 = vmul.f32 0.6931472, %v1128_v20  ;;  %v770_v42 = vmul.f32 0.6931472, %v1130_v31  ;;  %v690_v44 = vmul.f32 %v680_v12, %v680_v12  ;;  %v795_v43 = vadd.f32 %v794_v30, %v786_v59 }
 0x140   : > { %v724_v45 = vadd.f32 %v723_v24, %v715_v27  ;;  %v788_v37 = vand.u32 2147483647, %v778_v16  ;;  %v698_v41 = vadd.f32 %v697_v35, %v689_v34  ;;  %v780_v39 = vsub.f32 %v748_v32, %v768_v33 }
 0x141   : > { %v828_v50 = vrot.slane %v827_v38, 4  ;;  %v796_v53 = vadd.f32 %v795_v43, %v787_v56  ;;  %v789_v60 = vand.u32 2147483647, %v779_v40  ;;  %v781_v46 = vsub.f32 %v750_v29, %v770_v42 }
 0x142   : > { %v1132_v49 = vpop.eup %1131  ;;  %v725_v25 = vadd.f32 %v724_v45, %v716_v36  ;;  %v699_v13 = vadd.f32 %v698_v41, %v690_v44  ;;  %v790_v54 = vand.u32 2147483647, %v780_v39  ;;  %v835_v10 = vlaneseq }
 0x143   : > { %v752_v61 = vmul.f32 0.6931472, %v1132_v49  ;;  %v797_v0 = vadd.f32 %v796_v53, %v788_v37  ;;  %v829_v3 = vadd.f32 %v828_v50, %v827_v38  ;;  %v791_v58 = vand.u32 2147483647, %v781_v46 }
 0x144   : > { %v726_v1 = vrot.slane %v725_v25, 4  ;;  %v700_v62 = vrot.slane %v699_v13, 4  ;;  %v836_v26 = vshrl.u32 %v835_v10, 7 }
 0x145   : > { %v798_v59 = vadd.f32 %v797_v0, %v789_v60  ;;  %v830_v9 = vrot.slane %v829_v3, 2 }
 0x146   : > { %v1134_v55 = vpop.eup %1133  ;;  %v727_v51 = vadd.f32 %v726_v1, %v725_v25  ;;  %v701_v48 = vadd.f32 %v700_v62, %v699_v13  ;;  %vm840_vm9 = vcmp.eq.s32.totalorder %v836_v26, 3  ;;  %vm839_vm10 = vcmp.eq.s32.totalorder %v836_v26, 2 }
 0x147   : > { %v772_v52 = vmul.f32 0.6931472, %v1134_v55  ;;  %v799_v47 = vadd.f32 %v798_v59, %v790_v54  ;;  %v831_v7 = vadd.f32 %v830_v9, %v829_v3  ;;  %vm838_vm11 = vcmp.eq.s32.totalorder %v836_v26, 1 }
 0x148   : > { %v728_v57 = vrot.slane %v727_v51, 2  ;;  %v702_v63 = vrot.slane %v701_v48, 2  ;;  %vm837_vm12 = vcmp.eq.s32.totalorder %v836_v26, 0 }
 0x149   : > { %v782_v5 = vsub.f32 %v752_v61, %v772_v52  ;;  %v800_v6 = vadd.f32 %v799_v47, %v791_v58  ;;  %v832_v17 = vrot.slane %v831_v7, 1 }
 0x14a   : > { %v729_v12 = vadd.f32 %v728_v57, %v727_v51  ;;  %v703_v18 = vadd.f32 %v702_v63, %v701_v48 }
 0x14b   : > { %v792_v56 = vand.u32 2147483647, %v782_v5  ;;  %v833_v21 = vadd.f32 %v832_v17, %v831_v7 }
 0x14c   : > { %v730_v30 = vrot.slane %v729_v12, 1  ;;  %v704_v2 = vrot.slane %v703_v18, 1 }
 0x14d   : > { %v801_v4 = vadd.f32 %v800_v6, %v792_v56  ;;  %v841_v27 = vsel %vm840_vm9, %v833_v21, 0.0 }
 0x14e   : > { %v731_v23 = vadd.f32 %v730_v30, %v729_v12  ;;  %v705_v15 = vadd.f32 %v704_v2, %v703_v18 }
 0x14f   : > { %v802_v8 = vrot.slane %v801_v4, 4 }
 0x151   : > { %v803_v11 = vadd.f32 %v802_v8, %v801_v4 }
 0x153   : > { %v804_v19 = vrot.slane %v803_v11, 2 }
 0x155   : > { %v805_v14 = vadd.f32 %v804_v19, %v803_v11 }
 0x157   : > { %v806_v22 = vrot.slane %v805_v14, 1 }
 0x159   : > { %v807_v20 = vadd.f32 %v806_v22, %v805_v14 }
 0x15b   : > { %v842_v28 = vsel %vm839_vm10, %v807_v20, %v841_v27 }
 0x15c   : > { %v843_v31 = vsel %vm838_vm11, %v731_v23, %v842_v28 }
 0x15d   : > { %v844_v16 = vsel %vm837_vm12, %v705_v15, %v843_v31 }
 0x15e   : > { %847 = vst [vmem:[%s154_s29] sm:$0xff] %v844_v16 }
 0x15f   : > { %1148 = shalt.err (!%p1145_p5)
}
 0x160   : > { %s1149_s16 = scalar_lea.hbm %s860_s5, 128  ;;  %s1153_s23 = scalar_lea.hbm %s1665_s2, 256 }
 0x161   : > { %p1150_p6 = scmp.ne.s32.totalorder %s860_s5, %s1149_s16  ;;  %p1154_p10 = scmp.lt.s32.totalorder %s860_s5, %s1665_s2 }
 0x162   : > { %p1155_p11 = scmp.lt.s32.totalorder %s1153_s23, %s1149_s16 }
 0x163   : > { %p1151_p7 = pnand %p1150_p6, %p1270_p4 }
 0x164   : > { %p1156_p12 = por %p1155_p11, %p1154_p10 }
 0x165   : > { %p1152_p9 = pneg %p1151_p7 }
 0x167   : > { %p1157_p13 = pnand %p1156_p12, %p1152_p9 }
 0x169   : > { %1160 = shalt.err (!%p1157_p13)
}
 0x16a   : > { %976 = dma.vmem_to_hbm [thread:$0]  (%p1270_p4), %s863_s30, 128, %s860_s5, %s849_s6  }
 0x16b PF: > { %p982_p0 = scmp.ge.s32.totalorder %s1211_s14, 2  ;;  %s874_s26 = sand.u32 1, %s1191_s9  }
 0x16c   : > { %s875_s27 = scalar_lea.sflag [#allocation3], %s874_s26 }
 0x16d   : > { %p979_p1 = pnand %p982_p0, %p1277_p8 }
 0x16f   : > { %p980_p2 = pneg %p979_p1 }
 0x171   : > { %1186 = dma.done.wait (%p980_p2), %s875_s27, 128  }
 0x172   : > { %1188 = vsyncadd (%p980_p2), %s875_s27, 4294967168  ;;  %s15_s14 = sadd.s32 1, %s1211_s14   ;;  %s1668_s9 = smov %s1195_s10 }
 0x173   : > { %p12_p3 = scmp.ge.s32.totalorder %s15_s14, 4   ;;  %s1669_s10 = smov %s1199_s11 }
 0x174   : > { %s1670_s11 = smov %s1283_s22  ;;  %s1671_s12 = smov %s1207_s13 }
 0x175   : > { %s1672_s13 = smov %s1674_s17  ;;  %14 = sbr.rel (!%p12_p3) target bundleno = 4 (0x4), region = 67 }
 0x17a   :  { %880 = vsyncpa [#allocation3], 1 }
 0x17b   :  { %882 = vsyncpa [#allocation3 + $0x1], 1 }

</bundles_post_ra>
